<compile_context>
chip_gen: v6e
topology: v6e:2x2x1
jax: 0.10.0
libtpu: 0.0.40
codegen_flags: <defaults>
</compile_context>

<pallas_src>
import jax
import jax.numpy as jnp
import numpy as np
from jax.experimental import pallas as pl
from jax.experimental.pallas import tpu as pltpu


def _concat_kernel(*refs):
    # refs = (in_ref_0, ..., in_ref_{k-1}, o_ref)
    in_refs = refs[:-1]
    o_ref = refs[-1]
    off = 0
    for r in in_refs:
        c = r.shape[1]
        # Static channel offsets -> plain stores into the output tile.
        o_ref[:, off:off + c, :] = r[...]
        off += c


def _pick_hw_chunk(hw, total_channels, itemsize, vmem_budget_bytes=32 * 1024 * 1024,
                   max_lanes=2048):
    """Largest lane-dense (multiple-of-128) chunk that divides HW and fits VMEM."""
    if hw < 128 or hw % 128 != 0:
        # Block last-dim must be a multiple of 128 OR equal the full array dim.
        return hw
    # Per grid step: every input tile + the output tile, double-buffered.
    bytes_per_lane = 2 * total_channels * itemsize * 2  # (inputs+output) ~= 2*C_total
    budget_lanes = max(128, (vmem_budget_bytes // max(bytes_per_lane, 1)) // 128 * 128)
    cap = min(hw, max_lanes, budget_lanes)
    best = 128
    c = 128
    while c <= cap:
        if hw % c == 0:
            best = c
        c += 128
    return best


def concat(xs, dim=1):
    """Pallas port of Concat.forward: torch.cat(x, 1) for NCHW feature maps."""
    assert dim == 1, "only channel concat (dim=1) is implemented"
    assert len(xs) >= 1
    N, _, H, W = xs[0].shape
    dtype = xs[0].dtype
    for a in xs:
        assert a.shape[0] == N and a.shape[2] == H and a.shape[3] == W
    xs = [a.astype(dtype) for a in xs]

    HW = H * W
    channels = [int(a.shape[1]) for a in xs]
    C_total = sum(channels)

    chunk = _pick_hw_chunk(HW, C_total, jnp.dtype(dtype).itemsize)
    n_chunks = HW // chunk

    xs2 = [a.reshape(N, c, HW) for a, c in zip(xs, channels)]

    in_specs = [
        pl.BlockSpec((1, c, chunk), lambda b, s: (b, 0, s)) for c in channels
    ]
    out_spec = pl.BlockSpec((1, C_total, chunk), lambda b, s: (b, 0, s))

    out = pl.pallas_call(
        _concat_kernel,
        out_shape=jax.ShapeDtypeStruct((N, C_total, HW), dtype),
        grid=(N, n_chunks),
        in_specs=in_specs,
        out_specs=out_spec,
        compiler_params=pltpu.CompilerParams(
            dimension_semantics=("parallel", "parallel"),
        ),
    )(*xs2)

    return out.reshape(N, C_total, H, W)


def reference(xs, dim=1):
    return jnp.concatenate(xs, axis=dim)


if __name__ == "__main__":
    key = jax.random.PRNGKey(0)
    k1, k2, k3 = jax.random.split(key, 3)

    N, H, W = 2, 16, 16
    # Mixed channel counts (incl. non-multiples of 8) like real YOLOR route layers.
    xs = [
        jax.random.normal(k1, (N, 4, H, W), jnp.float32),
        jax.random.normal(k2, (N, 6, H, W), jnp.float32),
        jax.random.normal(k3, (N, 8, H, W), jnp.float32),
    ]

    y = concat(xs, dim=1)
    y = jax.block_until_ready(y)

    y_ref = reference(xs, dim=1)
    np.testing.assert_allclose(np.asarray(y), np.asarray(y_ref), rtol=0, atol=0)

    print("KERNEL_OK")
</pallas_src>

<mosaic_0001>
module attributes {stable_mosaic.version = 11 : i64} {
  func.func @_concat_kernel(%arg0: i32, %arg1: i32, %arg2: memref<1x4x256xf32, #tpu.memory_space<vmem>>, %arg3: memref<1x6x256xf32, #tpu.memory_space<vmem>>, %arg4: memref<1x8x256xf32, #tpu.memory_space<vmem>>, %arg5: memref<1x18x256xf32, #tpu.memory_space<vmem>>) attributes {dimension_semantics = [#tpu.dimension_semantics<parallel>, #tpu.dimension_semantics<parallel>], iteration_bounds = array<i64: 2, 1>, scalar_prefetch = 0 : i64, scratch_operands = 0 : i64, tpu.core_type = #tpu.core_type<tc>, window_params = [{transform_indices = @transform_0, window_bounds = array<i64: 1, 4, 256>}, {transform_indices = @transform_1, window_bounds = array<i64: 1, 6, 256>}, {transform_indices = @transform_2, window_bounds = array<i64: 1, 8, 256>}, {transform_indices = @transform_3, window_bounds = array<i64: 1, 18, 256>}]} {
    %c0 = arith.constant 0 : index
    %c0_0 = arith.constant 0 : index
    %c0_1 = arith.constant 0 : index
    %0 = vector.load %arg2[%c0, %c0_0, %c0_1] : memref<1x4x256xf32, #tpu.memory_space<vmem>>, vector<1x4x256xf32>
    %c0_2 = arith.constant 0 : index
    %c0_3 = arith.constant 0 : index
    %c0_4 = arith.constant 0 : index
    %1 = vector.load %arg5[%c0_2, %c0_3, %c0_4] : memref<1x18x256xf32, #tpu.memory_space<vmem>>, vector<1x4x256xf32>
    tpu.vector_store %arg5[%c0_2, %c0_3, %c0_4], %0 {strides = array<i32>} : memref<1x18x256xf32, #tpu.memory_space<vmem>>, vector<1x4x256xf32>,
    %c0_5 = arith.constant 0 : index
    %c0_6 = arith.constant 0 : index
    %c0_7 = arith.constant 0 : index
    %2 = vector.load %arg3[%c0_5, %c0_6, %c0_7] : memref<1x6x256xf32, #tpu.memory_space<vmem>>, vector<1x6x256xf32>
    %c0_8 = arith.constant 0 : index
    %c4 = arith.constant 4 : index
    %c0_9 = arith.constant 0 : index
    %3 = vector.load %arg5[%c0_8, %c4, %c0_9] : memref<1x18x256xf32, #tpu.memory_space<vmem>>, vector<1x6x256xf32>
    tpu.vector_store %arg5[%c0_8, %c4, %c0_9], %2 {strides = array<i32>} : memref<1x18x256xf32, #tpu.memory_space<vmem>>, vector<1x6x256xf32>,
    %c0_10 = arith.constant 0 : index
    %c0_11 = arith.constant 0 : index
    %c0_12 = arith.constant 0 : index
    %4 = vector.load %arg4[%c0_10, %c0_11, %c0_12] : memref<1x8x256xf32, #tpu.memory_space<vmem>>, vector<1x8x256xf32>
    %c0_13 = arith.constant 0 : index
    %c10 = arith.constant 10 : index
    %c0_14 = arith.constant 0 : index
    %5 = vector.load %arg5[%c0_13, %c10, %c0_14] : memref<1x18x256xf32, #tpu.memory_space<vmem>>, vector<1x8x256xf32>
    tpu.vector_store %arg5[%c0_13, %c10, %c0_14], %4 {strides = array<i32>} : memref<1x18x256xf32, #tpu.memory_space<vmem>>, vector<1x8x256xf32>,
    return
  }
  func.func @transform_0(%arg0: i32, %arg1: i32) -> (i32, i32, i32) {
    %c0_i32 = arith.constant 0 : i32
    %c0_i32_0 = arith.constant 0 : i32
    return %arg0, %c0_i32, %arg1 : i32, i32, i32
  }
  func.func @transform_1(%arg0: i32, %arg1: i32) -> (i32, i32, i32) {
    %c0_i32 = arith.constant 0 : i32
    %c0_i32_0 = arith.constant 0 : i32
    return %arg0, %c0_i32, %arg1 : i32, i32, i32
  }
  func.func @transform_2(%arg0: i32, %arg1: i32) -> (i32, i32, i32) {
    %c0_i32 = arith.constant 0 : i32
    %c0_i32_0 = arith.constant 0 : i32
    return %arg0, %c0_i32, %arg1 : i32, i32, i32
  }
  func.func @transform_3(%arg0: i32, %arg1: i32) -> (i32, i32, i32) {
    %c0_i32 = arith.constant 0 : i32
    %c0_i32_0 = arith.constant 0 : i32
    return %arg0, %c0_i32, %arg1 : i32, i32, i32
  }
}

</mosaic_0001>

<bundles_post_ra>
// kernel: tpu_custom_call.1
= control target key start
LH: loop header
LB: loop body
LE: loop exit
PB: predicated region body
PF: predicated region fallthrough
CT: control target
= control target key end

     0   :  { %s522_s12 = smov 0   ;;  %s524_s13 = smov 0   ;;  %s561_s0 = inlined_call_operand.vmem [shape: f32[2,4,256], index: 0, kind: input, shape index: {}]   ;;  %s562_s1 = inlined_call_operand.vmem [shape: f32[2,6,256], index: 1, kind: input, shape index: {}]   ;;  %s563_s2 = inlined_call_operand.vmem [shape: f32[2,8,256], index: 2, kind: input, shape index: {}]   ;;  %s564_s3 = inlined_call_operand.vmem [shape: f32[2,18,256], index: 3, kind: output, shape index: {}]  }
   0x1   :  { %s526_s14 = smov 0  }
   0x2 LB: > { %s25_s15 = sadd.s32 1, %s496_s13  ;;  %p439_p0 = scmp.ge.s32.totalorder %s500_s14, 1  ;;  %s500_s14 = sphi %s526_s14, %s13_s14   ;;  %s496_s13 = sphi %s524_s13, %s566_s13   ;;  %s492_s12 = sphi %s522_s12, %s565_s12  }
   0x3   : > { %p27_p1 = scmp.ge.s32.totalorder %s25_s15, 2  ;;  %p192_p2 = scmp.lt.s32.totalorder %s500_s14, 3 }
   0x5   : > { %s568_s15 = smov (%p27_p1, %s25_s15), 0  ;;  %p193_p3 = pnand %p439_p0, %p192_p2 }
   0x6   : > { %p243_p4 = scmp.lt.s32.totalorder (!%p193_p3), %s492_s12, 1 }
   0x7   : > { %196 = sbr.rel (%p193_p3) target bundleno = 22 (0x16), region = 32 }
   0xc   : > { %s570_s12 = smov (!%p243_p4, %s492_s12), 1 }
   0xd   : > { %s449_s16 = sshll.u32 %s570_s12, 3  ;;  %s452_s17 = smul.u32 48, %s570_s12 }
   0xe   : > { %s250_s20 = scalar_lea.vmem %s561_s0, %s449_s16  ;;  %s450_s21 = sshll.u32 %s570_s12, 4 }
   0xf   : > { %s280_s24 = scalar_lea.vmem %s564_s3, %s452_s17  ;;  %v282_v0 = vld [vmem:[%s250_s20] sm:$0xff]  ;;  %s260_s27 = scalar_lea.vmem %s562_s1, %s450_s21 }
  0x10   : > { %286 = vst [vmem:[%s280_s24] sm:$0xf] %v282_v0  ;;  %v284_v1 = vcombine.high %v282_v0, %v282_v0  ;;  %v288_v2 = vld [vmem:[%s260_s27] sm:$0x3f]  ;;  %v289_v3 = vld [vmem:[%s260_s27 + $0x8] sm:$0x3f]  ;;  %s270_s30 = scalar_lea.vmem %s563_s2, %s450_s21 }
  0x11   : > { %v292_v4 = vrot.slane %v288_v2, 4  ;;  %v293_v5 = vrot.slane %v289_v3, 4  ;;  %v300_v6 = vld [vmem:[%s270_s30] sm:$0xff]  ;;  %v301_v7 = vld [vmem:[%s270_s30 + $0x8] sm:$0xff] }
  0x12   : > { %287 = vst [vmem:[%s280_s24 + $0x8] sm:$0xf] %v284_v1  ;;  %v304_v8 = vrot.slane %v300_v6, 6  ;;  %v305_v9 = vrot.slane %v301_v7, 6 }
  0x13   : > { %296 = vst [vmem:[%s280_s24 + $0x10] ss:$-12 sps:$4 sm:$0xf3] %v292_v4   ;;  %297 = vst [vmem:[%s280_s24 + $0x18] ss:$-12 sps:$4 sm:$0xf3] %v293_v5  }
  0x14   : > { %308 = vst [vmem:[%s280_s24 + $0x10] sm:$0xfc] %v304_v8  ;;  %310 = vst [vmem:[%s280_s24 + $0x20] sm:$0x3] %v304_v8 }
  0x15   : > { %309 = vst [vmem:[%s280_s24 + $0x18] sm:$0xfc] %v305_v9  ;;  %311 = vst [vmem:[%s280_s24 + $0x28] sm:$0x3] %v305_v9 }
  0x16 PF: > { %s13_s14 = sadd.s32 1, %s500_s14   ;;  %s565_s12 = smov %s496_s13 }
  0x17   : > { %p10_p5 = scmp.ge.s32.totalorder %s13_s14, 4   ;;  %s566_s13 = smov %s568_s15 }
  0x19   :  { %12 = sbr.rel (!%p10_p5) target bundleno = 2 (0x2), region = 68 }

</bundles_post_ra>
